<compile_context>
chip_gen: v5e
topology: v5e:2x2
jax: 0.10.0
libtpu: 0.0.40
codegen_flags: <defaults>
</compile_context>

<pallas_src>
import jax
import jax.numpy as jnp
from jax.experimental import pallas as pl
from jax.experimental.pallas import tpu as pltpu  # noqa: F401  (kept for TPU backend import)


def csp_kernel(x_ref, w_sp_ref, w_cls_ref, b_cls_ref, out_ref):
    # x_ref:     (B, S, T)  all trials, EEG-channel on sublanes, time on lanes
    # w_sp_ref:  (C, S)     spatial filters (Conv2d weight reshaped)
    # w_cls_ref: (2, C)     classifier weight (PyTorch layout)
    # b_cls_ref: (1, 2)     classifier bias
    # out_ref:   (B, 2)     log-probabilities
    x = x_ref[...]                                   # (B, S, T)
    w_sp = w_sp_ref[...]                             # (C, S)
    B, S, _ = x.shape
    C = w_sp.shape[0]

    # Spatial filtering (Conv2d with kernel (S,1)) as a batched MXU matmul:
    #   y[b, c, t] = sum_s w_sp[c, s] * x[b, s, t]
    # T stays on the lane axis -> lane-dense vregs.
    w_b = jnp.broadcast_to(w_sp[None, :, :], (B, C, S))           # (B, C, S)
    y = jnp.einsum('bcs,bst->bct', w_b, x,
                   preferred_element_type=jnp.float32)            # (B, C, T)

    # Band power over time (lane reduction), then log.
    feat = jnp.log(jnp.sum(y * y, axis=2))                        # (B, C)

    # Tiny classifier: keep it on the VPU (broadcast-multiply-sum), not the MXU.
    w_cls = w_cls_ref[...]                                        # (2, C)
    logits = jnp.sum(feat[:, None, :] * w_cls[None, :, :], axis=-1)  # (B, 2)
    logits = logits + b_cls_ref[...]                              # (B, 2)

    # log_softmax over the class dimension.
    m = jnp.max(logits, axis=1, keepdims=True)
    lse = m + jnp.log(jnp.sum(jnp.exp(logits - m), axis=1, keepdims=True))
    out_ref[...] = logits - lse


def csp_forward(x_nchw, w_conv, w_cls, b_cls):
    """x_nchw: (B,1,S,T); w_conv: (C,1,S,1); w_cls: (2,C); b_cls: (2,)."""
    B, _, S, T = x_nchw.shape
    C = w_conv.shape[0]

    # Layout glue (all free reshapes — no transpose passes over HBM).
    x = x_nchw.reshape(B, S, T).astype(jnp.float32)      # (B, S, T), T on lanes
    w_sp = w_conv.reshape(C, S).astype(jnp.float32)      # (C, S)
    w_cls2 = w_cls.astype(jnp.float32)                   # (2, C)
    b = b_cls.reshape(1, 2).astype(jnp.float32)          # (1, 2)

    # Single invocation, no grid: every operand is DMA'd to VMEM exactly once
    # (whole-array default BlockSpecs) and the full (B, 2) output is written once.
    return pl.pallas_call(
        csp_kernel,
        out_shape=jax.ShapeDtypeStruct((B, 2), jnp.float32),
    )(x, w_sp, w_cls2, b)


def ref_forward(x_nchw, w_conv, w_cls, b_cls):
    """Pure-JAX reference mirroring the PyTorch forward."""
    B, _, S, T = x_nchw.shape
    C = w_conv.shape[0]
    x = x_nchw.reshape(B, S, T)
    y = jnp.einsum('cs,bst->bct', w_conv.reshape(C, S), x)
    feat = jnp.log(jnp.sum(y ** 2, axis=2))
    logits = feat @ w_cls.T + b_cls
    return jax.nn.log_softmax(logits, axis=1)


if __name__ == "__main__":
    # Small shapes consistent with the module: B=4 trials, S=16 EEG channels,
    # T=128 time samples, C=5 spatial filters.
    B, S, T, C = 4, 16, 128, 5

    key = jax.random.PRNGKey(0)
    kx, kw, kc, kb = jax.random.split(key, 4)
    x = jax.random.normal(kx, (B, 1, S, T), dtype=jnp.float32)
    w_conv = jax.random.normal(kw, (C, 1, S, 1), dtype=jnp.float32) * 0.1  # Conv2d weight
    w_cls = jax.random.normal(kc, (2, C), dtype=jnp.float32) * 0.1         # Linear weight
    b_cls = jax.random.normal(kb, (2,), dtype=jnp.float32) * 0.1           # Linear bias

    out = csp_forward(x, w_conv, w_cls, b_cls)
    out = jax.block_until_ready(out)

    ref = ref_forward(x, w_conv, w_cls, b_cls)
    assert out.shape == (B, 2)
    assert jnp.allclose(out, ref, atol=1e-4, rtol=1e-4), (out, ref)

    print("KERNEL_OK")
</pallas_src>

<mosaic_0001>
module attributes {stable_mosaic.version = 11 : i64} {
  func.func @csp_kernel(%arg0: memref<4x16x128xf32, #tpu.memory_space<vmem>>, %arg1: memref<5x16xf32, #tpu.memory_space<vmem>>, %arg2: memref<2x5xf32, #tpu.memory_space<vmem>>, %arg3: memref<1x2xf32, #tpu.memory_space<vmem>>, %arg4: memref<4x2xf32, #tpu.memory_space<vmem>>) attributes {dimension_semantics = [], scalar_prefetch = 0 : i64, scratch_operands = 0 : i64, tpu.core_type = #tpu.core_type<tc>} {
    %c0 = arith.constant 0 : index
    %c0_0 = arith.constant 0 : index
    %c0_1 = arith.constant 0 : index
    %0 = vector.load %arg0[%c0, %c0_0, %c0_1] : memref<4x16x128xf32, #tpu.memory_space<vmem>>, vector<4x16x128xf32>
    %c0_2 = arith.constant 0 : index
    %c0_3 = arith.constant 0 : index
    %1 = vector.load %arg1[%c0_2, %c0_3] : memref<5x16xf32, #tpu.memory_space<vmem>>, vector<5x16xf32>
    %2 = vector.shape_cast %1 : vector<5x16xf32> to vector<1x5x16xf32>
    %3 = vector.shape_cast %2 : vector<1x5x16xf32> to vector<1x5x16xf32>
    %4 = vector.broadcast %3 : vector<1x5x16xf32> to vector<4x5x16xf32>
    "tpu.trace_start"() <{level = 10 : i32, message = "bcs,bst->bct"}> : () -> ()
    %cst = arith.constant dense<0.000000e+00> : vector<4x5x128xf32>
    %5 = tpu.matmul %4, %0, %cst {dimension_numbers = #tpu.dot_dimension_numbers<[2], [1], [1], [2], [0, 0, 0, 1, 1, 2], [0], [0]>} : vector<4x5x16xf32>, vector<4x16x128xf32>, vector<4x5x128xf32> -> vector<4x5x128xf32>
    "tpu.trace_stop"() : () -> ()
    %6 = arith.mulf %5, %5 : vector<4x5x128xf32>
    %cst_4 = arith.constant dense<0.000000e+00> : vector<4x5xf32>
    %7 = vector.multi_reduction <add>, %6, %cst_4 [2] : vector<4x5x128xf32> to vector<4x5xf32>
    %8 = math.log %7 : vector<4x5xf32>
    %c0_5 = arith.constant 0 : index
    %c0_6 = arith.constant 0 : index
    %9 = vector.load %arg2[%c0_5, %c0_6] : memref<2x5xf32, #tpu.memory_space<vmem>>, vector<2x5xf32>
    %10 = vector.shape_cast %8 : vector<4x5xf32> to vector<4x1x5xf32>
    %11 = vector.shape_cast %9 : vector<2x5xf32> to vector<1x2x5xf32>
    %12 = vector.broadcast %10 : vector<4x1x5xf32> to vector<4x2x5xf32>
    %13 = vector.broadcast %11 : vector<1x2x5xf32> to vector<4x2x5xf32>
    %14 = arith.mulf %12, %13 : vector<4x2x5xf32>
    %cst_7 = arith.constant dense<0.000000e+00> : vector<4x2xf32>
    %15 = vector.multi_reduction <add>, %14, %cst_7 [2] : vector<4x2x5xf32> to vector<4x2xf32>
    %c0_8 = arith.constant 0 : index
    %c0_9 = arith.constant 0 : index
    %16 = vector.load %arg3[%c0_8, %c0_9] : memref<1x2xf32, #tpu.memory_space<vmem>>, vector<1x2xf32>
    %17 = vector.broadcast %16 : vector<1x2xf32> to vector<4x2xf32>
    %18 = arith.addf %15, %17 : vector<4x2xf32>
    %cst_10 = arith.constant dense<0xFF800000> : vector<4xf32>
    %19 = vector.multi_reduction <maximumf>, %18, %cst_10 [1] : vector<4x2xf32> to vector<4xf32>
    %20 = vector.shape_cast %19 : vector<4xf32> to vector<4x1xf32>
    %21 = vector.broadcast %20 : vector<4x1xf32> to vector<4x2xf32>
    %22 = arith.subf %18, %21 : vector<4x2xf32>
    %23 = math.exp %22 : vector<4x2xf32>
    %cst_11 = arith.constant dense<0.000000e+00> : vector<4xf32>
    %24 = vector.multi_reduction <add>, %23, %cst_11 [1] : vector<4x2xf32> to vector<4xf32>
    %25 = vector.shape_cast %24 : vector<4xf32> to vector<4x1xf32>
    %26 = math.log %25 : vector<4x1xf32>
    %27 = arith.addf %20, %26 : vector<4x1xf32>
    %28 = vector.broadcast %27 : vector<4x1xf32> to vector<4x2xf32>
    %29 = arith.subf %18, %28 : vector<4x2xf32>
    %c0_12 = arith.constant 0 : index
    %c0_13 = arith.constant 0 : index
    %30 = vector.load %arg4[%c0_12, %c0_13] : memref<4x2xf32, #tpu.memory_space<vmem>>, vector<4x2xf32>
    tpu.vector_store %arg4[%c0_12, %c0_13], %29 {strides = array<i32>} : memref<4x2xf32, #tpu.memory_space<vmem>>, vector<4x2xf32>,
    return
  }
}

</mosaic_0001>

<bundles_post_ra>
// kernel: tpu_custom_call.1
= control target key start
LH: loop header
LB: loop body
LE: loop exit
PB: predicated region body
PF: predicated region fallthrough
CT: control target
= control target key end

     0   :  { %9 = vsyncpa [#allocation3], 0  ;;  %s632_s0 = inlined_call_operand.hbm [shape: f32[4,16,128], index: 0, kind: input, shape index: {}]   ;;  %s633_s1 = inlined_call_operand.hbm [shape: f32[5,16], index: 1, kind: input, shape index: {}]   ;;  %s634_s2 = inlined_call_operand.hbm [shape: f32[2,5], index: 2, kind: input, shape index: {}]   ;;  %s635_s3 = inlined_call_operand.vmem [shape: f32[1,2], index: 3, kind: input, shape index: {}]   ;;  %s636_s4 = inlined_call_operand.vmem [shape: f32[4,2], index: 4, kind: output, shape index: {}]  }
   0x1   :  { %10 = vsyncpa [#allocation5], 0  ;;  %s29_s17 = sshll.u32 %s633_s1, 4  ;;  %s518_s18 = smov [#allocation4]   ;;  %s30_s17 = int_to_ptr.hbm [resolvable:$true] %s29_s17 }
   0x2   :  { %s31_s19 = sshll.u32 %s518_s18, 4  ;;  %s15_s22 = sshll.u32 %s632_s0, 4  ;;  %s32_s19 = int_to_ptr.vmem [resolvable:$true] %s31_s19  ;;  %s16_s22 = int_to_ptr.hbm [resolvable:$true] %s15_s22 }
   0x3   :  { %34 = dma.hbm_to_vmem [thread:$0]  %s30_s17, 128, %s32_s19, [#allocation5]  }
   0x4   :  { %s519_s23 = smov [#allocation2]   ;;  %s520_s25 = smov 128  }
   0x5   :  { %s17_s24 = sshll.u32 %s519_s23, 4  ;;  %s521_s26 = smov 8   ;;  %s18_s24 = int_to_ptr.vmem [resolvable:$true] %s17_s24 }
   0x6   :  { %23 = dma.hbm_to_vmem [thread:$0]  %s16_s22, 1024, %s18_s24, [#allocation3], %s520_s25, %s520_s25, %s521_s26  }
   0x7   :  { %s40_s1 = sshll.u32 %s634_s2, 4  ;;  %s522_s29 = smov [#allocation6]   ;;  %s41_s1 = int_to_ptr.hbm [resolvable:$true] %s40_s1 }
   0x8   :  { %s42_s30 = sshll.u32 %s522_s29, 4  ;;  %s43_s30 = int_to_ptr.vmem [resolvable:$true] %s42_s30 }
   0x9   :  { %45 = dma.hbm_to_vmem [thread:$0]  %s41_s1, 32, %s43_s30, [#allocation5]  }
   0xa   :  { %514 = dma.done.wait [#allocation3], 1024  }
   0xb   :  { %515 = vsyncadd [#allocation3], 4294966272 }
   0xc   :  { %516 = dma.done.wait [#allocation5], 160  }
   0xd   :  { %517 = vsyncadd [#allocation5], 4294967136  ;;  %v61_v0 = vld [vmem:[#allocation2 + $0x8] sm:$0xff]  ;;  %v60_v2 = vld [vmem:[#allocation2] sm:$0xff]  ;;  %vm69_vm0 = vcmask 130048   ;;  %v181_v9 = vlaneseq  ;;  %vm157_vm1 = vcmask 1044480  }
   0xe   :  { %v65_v1 = vld [vmem:[#allocation2 + $0x28] sm:$0xff]  ;;  %87 = vmatpush.msra.mxu0 %v61_v0  ;;  %v64_v3 = vld [vmem:[#allocation2 + $0x20] sm:$0xff]  ;;  %v63_v5 = vld [vmem:[#allocation2 + $0x18] sm:$0xff]  ;;  %v523_v26 = vmov 0   ;;  %vm246_vm2 = vcmask 1041409   ;;  %vm255_vm3 = vcmask 33792  }
   0xf   :  { %127 = vmatpush.msra.mxu2 %v65_v1  ;;  %v68_v4 = vld [vmem:[#allocation4] sm:$0x1f]  ;;  %107 = vmatpush.msra.mxu1 %v63_v5  ;;  %v67_v6 = vld [vmem:[#allocation2 + $0x38] sm:$0xff]  ;;  %v62_v7 = vld [vmem:[#allocation2 + $0x10] sm:$0xff]  ;;  %v182_v10 = vshrl.u32 %v181_v9, 7  ;;  %v563_v50 = vand.u32 127, %v181_v9 }
  0x10   :  { %88 = vmatpush.msra.mxu0 %v60_v2  ;;  %v66_v8 = vld [vmem:[#allocation2 + $0x30] sm:$0xff]  ;;  %147 = vmatpush.msra.mxu3 %v67_v6  ;;  %v178_v11 = vld [vmem:[#allocation6] sm:$0x3]  ;;  %vm303_vm4 = vcmask 1042434   ;;  %vm305_vm5 = vcmask 1043459   ;;  %vm308_vm6 = vcmask 11264  }
  0x11   :  { %128 = vmatpush.msra.mxu2 %v64_v3  ;;  %407 = vmatmul.msk.f32.vlgmr.msra.gmra.mxu0 %vm69_vm0, %v68_v4  ;;  %v180_v12 = vperm.slane %v178_v11, 0  ;;  %v187_v13 = vperm.slane %v178_v11, 1 }
  0x12   :  { %409 = vmatmul.msk.f32.vlgmr.msra.gmra.mxu2 %vm69_vm0, %v68_v4  ;;  %108 = vmatpush.msra.mxu1 %v62_v7 }
  0x13   :  { %408 = vmatmul.msk.f32.vlgmr.msra.gmra.mxu1 %vm69_vm0, %v68_v4  ;;  %148 = vmatpush.msra.mxu3 %v66_v8 }
  0x14   :  { %410 = vmatmul.msk.f32.vlgmr.msra.gmra.mxu3 %vm69_vm0, %v68_v4  ;;  %417 = vset.pattern.permute.xlu2 %v182_v10 }
  0x15   :  { %419 = vset.pattern.permute.xlu1 %v523_v26  ;;  %418 = vset.pattern.permute.xlu0 %v523_v26 }
  0x1c   :  { %185 = vperm.xlu2 %417, %v180_v12  }
  0x24   :  { %192 = vperm.xlu2 %417, %v187_v13  }
  0x2c   :  { %420 = vset.pattern.permute.xlu2 %v523_v26 }
  0x76   :  { %v186_v27 = vpop.permute.xlu2 %185 }
  0x7e   :  { %v193_v33 = vpop.permute.xlu2 %192 }
  0x8e   :  { %v90_v14 = vpop.f32.mrf.mxu0 }
  0x8f   :  { %v153_v15 = vmul.f32 %v90_v14, %v90_v14 }
  0x90   :  { %v110_v16 = vpop.f32.mrf.mxu1 }
  0x91   :  { %v158_v17 = vsel %vm157_vm1, %v153_v15, 0.0  ;;  %v154_v18 = vmul.f32 %v110_v16, %v110_v16 }
  0x92   :  { %159 = vadd.xlane.f32.xlu0 %v158_v17 }
  0x93   :  { %v161_v22 = vsel %vm157_vm1, %v154_v18, 0.0 }
  0x95   :  { %v130_v19 = vpop.f32.mrf.mxu2 }
  0x96   :  { %v155_v20 = vmul.f32 %v130_v19, %v130_v19 }
  0x97   :  { %v150_v23 = vpop.f32.mrf.mxu3 }
  0x98   :  { %v164_v21 = vsel %vm157_vm1, %v155_v20, 0.0  ;;  %v156_v24 = vmul.f32 %v150_v23, %v150_v23 }
  0x99   :  { %165 = vadd.xlane.f32.xlu1 %v164_v21 }
  0x9a   :  { %162 = vadd.xlane.f32.xlu0 %v161_v22  ;;  %v167_v25 = vsel %vm157_vm1, %v156_v24, 0.0 }
  0xa1   :  { %168 = vadd.xlane.f32.xlu1 %v167_v25 }
 0x105   :  { %v160_v28 = vpop.xlane.xlu0 %159 }
 0x106   :  { %424 = vlog2.f32 %v160_v28 }
 0x10c   :  { %v166_v29 = vpop.xlane.xlu1 %165  ;;  %v425_v30 = vpop.eup %424 }
 0x10d   :  { %v171_v31 = vmul.f32 0.6931472, %v425_v30  ;;  %v163_v32 = vpop.xlane.xlu0 %162 }
 0x10e   :  { %426 = vlog2.f32 %v163_v32 }
 0x10f   :  { %v197_v34 = vmul.f32 %v193_v33, %v171_v31  ;;  %v196_v35 = vmul.f32 %v186_v27, %v171_v31 }
 0x111   :  { %216 = vperm.xlu1 %419, %v197_v34   ;;  %213 = vperm.xlu0 %418, %v196_v35  }
 0x114   :  { %v169_v36 = vpop.xlane.xlu1 %168  ;;  %v427_v37 = vpop.eup %426 }
 0x115   :  { %428 = vlog2.f32 %v169_v36  ;;  %v173_v38 = vmul.f32 0.6931472, %v427_v37 }
 0x116   :  { %430 = vlog2.f32 %v166_v29 }
 0x117   :  { %v198_v39 = vmul.f32 %v186_v27, %v173_v38  ;;  %v199_v43 = vmul.f32 %v193_v33, %v173_v38 }
 0x119   :  { %219 = vperm.xlu2 %420, %v198_v39  }
 0x11b   :  { %v429_v40 = vpop.eup %428 }
 0x11c   :  { %v177_v41 = vmul.f32 0.6931472, %v429_v40  ;;  %v431_v44 = vpop.eup %430 }
 0x11d   :  { %v175_v45 = vmul.f32 0.6931472, %v431_v44 }
 0x11e   :  { %v202_v42 = vmul.f32 %v186_v27, %v177_v41  ;;  %v203_v48 = vmul.f32 %v193_v33, %v177_v41 }
 0x11f   :  { %v200_v46 = vmul.f32 %v186_v27, %v175_v45  ;;  %v201_v47 = vmul.f32 %v193_v33, %v175_v45 }
 0x120   :  { %231 = vperm.xlu1 %419, %v202_v42  }
 0x121   :  { %222 = vperm.xlu2 %420, %v199_v43  }
 0x128   :  { %421 = vset.pattern.permute.xlu1 %v182_v10  ;;  %v423_v10 = vld [vmem:[%s635_s3] ss:$0 sm:$0xff] }
 0x129   :  { %225 = vperm.xlu2 %420, %v200_v46  }
 0x131   :  { %228 = vperm.xlu2 %420, %v201_v47  }
 0x139   :  { %234 = vperm.xlu2 %420, %v203_v48  }
 0x173   :  { %v220_v49 = vpop.permute.xlu2 %219 }
 0x174   :  { %v240_v52 = vperm.slane %v220_v49, %v563_v50 }
 0x17b   :  { %v223_v51 = vpop.permute.xlu2 %222 }
 0x17c   :  { %v241_v53 = vperm.slane %v223_v51, %v563_v50 }
 0x17e   :  { %v248_v54 = vsel %vm246_vm2, %v241_v53, %v240_v52 }
 0x17f   :  { %v259_v55 = vsel %vm255_vm3, %v248_v54, 0.0 }
 0x180   :  { %260 = vadd.xlane.f32.xlu0 %v259_v55 }
 0x183   :  { %v217_v56 = vpop.permute.xlu1 %216  ;;  %v226_v57 = vpop.permute.xlu2 %225 }
 0x184   :  { %v239_v58 = vperm.slane %v217_v56, %v563_v50  ;;  %v214_v59 = vpop.permute.xlu0 %213  ;;  %v242_v0 = vperm.slane %v226_v57, %v563_v50 }
 0x185   :  { %v238_v60 = vperm.slane %v214_v59, %v563_v50 }
 0x187   :  { %v247_v61 = vsel %vm246_vm2, %v239_v58, %v238_v60 }
 0x188   :  { %v256_v62 = vsel %vm255_vm3, %v247_v61, 0.0 }
 0x189   :  { %257 = vadd.xlane.f32.xlu1 %v256_v62 }
 0x18b   :  { %v229_v63 = vpop.permute.xlu2 %228 }
 0x18c   :  { %v243_v1 = vperm.slane %v229_v63, %v563_v50 }
 0x18e   :  { %v249_v2 = vsel %vm246_vm2, %v243_v1, %v242_v0 }
 0x18f   :  { %v262_v3 = vsel %vm255_vm3, %v249_v2, 0.0 }
 0x190   :  { %263 = vadd.xlane.f32.xlu2 %v262_v3 }
 0x192   :  { %v232_v4 = vpop.permute.xlu1 %231 }
 0x193   :  { %v235_v5 = vpop.permute.xlu2 %234  ;;  %v244_v6 = vperm.slane %v232_v4, %v563_v50 }
 0x194   :  { %v245_v7 = vperm.slane %v235_v5, %v563_v50 }
 0x196   :  { %v250_v8 = vsel %vm246_vm2, %v245_v7, %v244_v6 }
 0x197   :  { %v265_v9 = vsel %vm255_vm3, %v250_v8, 0.0 }
 0x198   :  { %266 = vadd.xlane.f32.xlu2 %v265_v9 }
 0x1a2   :  { %275 = vperm.xlu1 %421, %v423_v10  }
 0x1aa   :  { %422 = vset.pattern.permute.xlu1 %v523_v26 }
 0x1f3   :  { %v261_v13 = vpop.xlane.xlu0 %260 }
 0x1fc   :  { %v258_v11 = vpop.xlane.xlu1 %257 }
 0x203   :  { %v264_v12 = vpop.xlane.xlu2 %263 }
 0x20b   :  { %v267_v18 = vpop.xlane.xlu2 %266 }
 0x214   :  { %v276_v14 = vpop.permute.xlu1 %275 }
 0x215   :  { %v585_v15 = vadd.f32 %v276_v14, %v264_v12  ;;  %v587_v16 = vadd.f32 %v276_v14, %v258_v11  ;;  %v589_v17 = vadd.f32 %v276_v14, %v261_v13  ;;  %v594_v19 = vadd.f32 %v276_v14, %v267_v18 }
 0x217   :  { %293 = vperm.xlu1 %422, %v585_v15   ;;  %287 = vperm.xlu0 %418, %v587_v16  }
 0x218   :  { %290 = vperm.xlu2 %420, %v589_v17  }
 0x21f   :  { %296 = vperm.xlu0 %418, %v594_v19  }
 0x272   :  { %v291_v21 = vpop.permute.xlu2 %290 }
 0x273   :  { %v299_v24 = vperm.slane %v291_v21, %v563_v50 }
 0x289   :  { %v288_v20 = vpop.permute.xlu0 %287  ;;  %v294_v22 = vpop.permute.xlu1 %293 }
 0x28a   :  { %v298_v23 = vperm.slane %v288_v20, %v563_v50  ;;  %v300_v25 = vperm.slane %v294_v22, %v563_v50 }
 0x28c   :  { %v302_v26 = vsel %vm246_vm2, %v299_v24, %v298_v23 }
 0x28d   :  { %v304_v29 = vsel %vm303_vm4, %v300_v25, %v302_v26 }
 0x291   :  { %v297_v27 = vpop.permute.xlu0 %296 }
 0x292   :  { %v301_v28 = vperm.slane %v297_v27, %v563_v50 }
 0x294   :  { %v306_v30 = vsel %vm305_vm5, %v301_v28, %v304_v29 }
 0x295   :  { %v309_v31 = vsel %vm308_vm6, %v306_v30, -inf }
 0x296   :  { %310 = vmax.xlane.f32.xlu1 %v309_v31 }
 0x309   :  { %v311_v32 = vpop.xlane.xlu1 %310 }
 0x30a   :  { %v313_v33 = vperm.slane %v311_v32, 0  ;;  %v314_v34 = vperm.slane %v311_v32, 1  ;;  %v315_v35 = vperm.slane %v311_v32, 2  ;;  %v316_v38 = vperm.slane %v311_v32, 3 }
 0x30c   :  { %v321_v36 = vsub.f32 %v587_v16, %v313_v33  ;;  %v322_v37 = vsub.f32 %v589_v17, %v314_v34  ;;  %v323_v41 = vsub.f32 %v585_v15, %v315_v35  ;;  %v324_v42 = vsub.f32 %v594_v19, %v316_v38 }
 0x30e   :  { %v325_v39 = vmul.f32 1.442695, %v321_v36  ;;  %v327_v40 = vmul.f32 1.442695, %v322_v37  ;;  %v329_v43 = vmul.f32 1.442695, %v323_v41 }
 0x30f   :  { %v331_v44 = vmul.f32 1.442695, %v324_v42 }
 0x310   :  { %432 = vpow2.f32 %v325_v39 }
 0x311   :  { %434 = vpow2.f32 %v327_v40 }
 0x312   :  { %436 = vpow2.f32 %v329_v43 }
 0x313   :  { %438 = vpow2.f32 %v331_v44 }
 0x316   :  { %v433_v45 = vpop.eup %432 }
 0x317   :  { %v435_v46 = vpop.eup %434  ;;  %338 = vperm.xlu0 %418, %v433_v45  }
 0x318   :  { %341 = vperm.xlu2 %420, %v435_v46   ;;  %v437_v47 = vpop.eup %436 }
 0x319   :  { %v439_v48 = vpop.eup %438 }
 0x31f   :  { %344 = vperm.xlu0 %418, %v437_v47  }
 0x320   :  { %347 = vperm.xlu2 %420, %v439_v48  }
 0x372   :  { %v342_v49 = vpop.permute.xlu2 %341 }
 0x373   :  { %v350_v54 = vperm.slane %v342_v49, %v563_v50 }
 0x37a   :  { %v348_v53 = vpop.permute.xlu2 %347 }
 0x37b   :  { %v352_v57 = vperm.slane %v348_v53, %v563_v50 }
 0x389   :  { %v339_v51 = vpop.permute.xlu0 %338 }
 0x38a   :  { %v349_v52 = vperm.slane %v339_v51, %v563_v50 }
 0x38c   :  { %v353_v58 = vsel %vm246_vm2, %v350_v54, %v349_v52 }
 0x391   :  { %v345_v55 = vpop.permute.xlu0 %344 }
 0x392   :  { %v351_v56 = vperm.slane %v345_v55, %v563_v50 }
 0x394   :  { %v354_v59 = vsel %vm303_vm4, %v351_v56, %v353_v58 }
 0x395   :  { %v355_v60 = vsel %vm305_vm5, %v352_v57, %v354_v59 }
 0x396   :  { %v357_v61 = vsel %vm308_vm6, %v355_v60, 0.0 }
 0x397   :  { %358 = vadd.xlane.f32.xlu0 %v357_v61 }
 0x40a   :  { %v359_v62 = vpop.xlane.xlu0 %358 }
 0x40b   :  { %440 = vlog2.f32 %v359_v62 }
 0x411   :  { %v441_v63 = vpop.eup %440 }
 0x412   :  { %v361_v0 = vmul.f32 0.6931472, %v441_v63 }
 0x414   :  { %v362_v1 = vadd.f32 %v361_v0, %v311_v32 }
 0x416   :  { %v367_v2 = vperm.slane %v362_v1, 3  ;;  %v364_v3 = vperm.slane %v362_v1, 0  ;;  %v365_v6 = vperm.slane %v362_v1, 1  ;;  %v366_v8 = vperm.slane %v362_v1, 2 }
 0x418   :  { %v375_v4 = vsub.f32 %v594_v19, %v367_v2  ;;  %v372_v5 = vsub.f32 %v587_v16, %v364_v3  ;;  %v373_v7 = vsub.f32 %v589_v17, %v365_v6  ;;  %v374_v9 = vsub.f32 %v585_v15, %v366_v8 }
 0x41a   :  { %390 = vperm.xlu1 %422, %v375_v4   ;;  %381 = vperm.xlu2 %420, %v372_v5  }
 0x422   :  { %384 = vperm.xlu2 %420, %v373_v7  }
 0x42a   :  { %387 = vperm.xlu2 %420, %v374_v9  }
 0x474   :  { %v382_v10 = vpop.permute.xlu2 %381 }
 0x475   :  { %v392_v18 = vperm.slane %v382_v10, %v563_v50 }
 0x47c   :  { %v385_v11 = vpop.permute.xlu2 %384 }
 0x47d   :  { %v393_v13 = vperm.slane %v385_v11, %v563_v50 }
 0x47f   :  { %v396_v19 = vsel %vm246_vm2, %v393_v13, %v392_v18 }
 0x484   :  { %v388_v12 = vpop.permute.xlu2 %387 }
 0x485   :  { %v394_v14 = vperm.slane %v388_v12, %v563_v50 }
 0x487   :  { %v397_v17 = vsel %vm303_vm4, %v394_v14, %v396_v19 }
 0x48c   :  { %v391_v16 = vpop.permute.xlu1 %390 }
 0x48d   :  { %v395_v20 = vperm.slane %v391_v16, %v563_v50 }
 0x48f   :  { %v398_v21 = vsel %vm305_vm5, %v395_v20, %v397_v17 }
 0x490   :  { %400 = vst.msk [vmem:[%s636_s4] sm:$0xf] %vm308_vm6, %v398_v21 }
 0x491   :  { %405 = vsyncpa [#allocation3], 1 }
 0x492   :  { %406 = vsyncpa [#allocation5], 1 }

</bundles_post_ra>
